<compile_context>
chip_gen: v6e
topology: v6e:2x2x1
jax: 0.10.0
libtpu: 0.0.40
codegen_flags: <defaults>
</compile_context>

<pallas_src>
import jax
import jax.numpy as jnp
from jax.experimental import pallas as pl
from jax.experimental.pallas import tpu as pltpu


def _choose_num_chunks(rows: int, cols: int, itemsize: int) -> int:
    """Number of concurrent DMAs: chunk only if each chunk is >= ~1 MiB."""
    total_bytes = rows * cols * itemsize
    for n in (8, 4, 2):
        if rows % n == 0 and total_bytes // n >= (1 << 20):
            return n
    return 1


def _make_hbm_copy_kernel(num_chunks: int, rows_per_chunk: int):
    """Kernel body: chunked HBM->HBM identity copy via async DMA.

    This is where the wrapped model's compute goes once `build` attaches it;
    for the bare base class it is a straight pass-through of the batch.
    """

    def kernel(x_hbm, o_hbm, sems):
        copies = []
        # Start all chunk DMAs (they fly concurrently on the DMA engines) ...
        for c in range(num_chunks):          # static Python loop -> unrolled
            start = c * rows_per_chunk
            cp = pltpu.make_async_copy(
                x_hbm.at[pl.ds(start, rows_per_chunk), :],
                o_hbm.at[pl.ds(start, rows_per_chunk), :],
                sems.at[c],
            )
            cp.start()
            copies.append(cp)
        # ... then wait for all of them.
        for cp in copies:
            cp.wait()

    return kernel


def _pallas_identity_copy(batch: jax.Array) -> jax.Array:
    """HBM->HBM DMA identity copy of the batch (no VMEM staging)."""
    orig_shape = batch.shape
    if batch.ndim >= 2:
        x2d = batch.reshape(-1, batch.shape[-1])   # metadata-only reshape
    else:
        x2d = batch.reshape(1, -1)
    rows, cols = x2d.shape

    num_chunks = _choose_num_chunks(rows, cols, x2d.dtype.itemsize)
    rows_per_chunk = rows // num_chunks

    out2d = pl.pallas_call(
        _make_hbm_copy_kernel(num_chunks, rows_per_chunk),
        out_shape=jax.ShapeDtypeStruct((rows, cols), x2d.dtype),
        in_specs=[pl.BlockSpec(memory_space=pl.ANY)],
        out_specs=pl.BlockSpec(memory_space=pl.ANY),
        scratch_shapes=[pltpu.SemaphoreType.DMA((num_chunks,))],
        compiler_params=pltpu.CompilerParams(has_side_effects=True),
    )(x2d)

    return out2d.reshape(orig_shape)


def learner_forward(batch: jax.Array, *, exercise_kernel: bool = False) -> jax.Array:
    """Forward pass of the (bare) LearnerModule.

    The base class defines no transformation of the batch, so the default
    (and fastest) path is a metadata-only identity: return the batch.  With
    `exercise_kernel=True` the batch is routed through the HBM->HBM DMA copy
    kernel above, which is the slot that hosts the wrapped model's compute
    once `build` attaches one.
    """
    if not exercise_kernel:
        return batch
    return _pallas_identity_copy(batch)


# TODO(synk): build / reset_parameters / configure_optimizers and the
# training/validation/test/predict step methods are abstract or host-side
# trainer plumbing (hydra instantiation, lr schedulers, logging) with no
# tensor compute — not translatable to a Pallas kernel.

if __name__ == "__main__":
    key = jax.random.PRNGKey(0)
    # Small NCHW batch consistent with an image-modality learner.
    x = jax.random.normal(key, (2, 4, 16, 16), dtype=jnp.float32)

    # Default (recommended) forward path: identity, no HBM traffic.
    y_fast = learner_forward(x)
    jax.block_until_ready(y_fast)
    assert y_fast.shape == x.shape and y_fast.dtype == x.dtype

    # Exercise the Pallas HBM->HBM DMA kernel once to validate it on-device.
    y_kernel = learner_forward(x, exercise_kernel=True)
    jax.block_until_ready(y_kernel)
    assert y_kernel.shape == x.shape and y_kernel.dtype == x.dtype
    assert bool(jnp.allclose(y_kernel, x))

    print("KERNEL_OK")
</pallas_src>

<mosaic_0001>
module attributes {stable_mosaic.version = 11 : i64} {
  func.func @kernel(%arg0: memref<128x16xf32, #tpu.memory_space<any>>, %arg1: memref<128x16xf32, #tpu.memory_space<any>>, %arg2: memref<1x!tpu.dma_semaphore, #tpu.memory_space<semaphore_mem>>) attributes {dimension_semantics = [], scalar_prefetch = 0 : i64, scratch_operands = 1 : i64, tpu.core_type = #tpu.core_type<tc>} {
    %c0_i32 = arith.constant 0 : i32
    %c0_i32_0 = arith.constant 0 : i32
    %c0_i32_1 = arith.constant 0 : i32
    %0 = tpu.memref_slice %arg0[%c0_i32_0, %c0_i32_1] : memref<128x16xf32, #tpu.memory_space<any>> -> memref<128x16xf32, #tpu.memory_space<any>>
    %c0_i32_2 = arith.constant 0 : i32
    %c0_i32_3 = arith.constant 0 : i32
    %1 = tpu.memref_slice %arg1[%c0_i32_2, %c0_i32_3] : memref<128x16xf32, #tpu.memory_space<any>> -> memref<128x16xf32, #tpu.memory_space<any>>
    %2 = tpu.memref_slice %arg2[%c0_i32] : memref<1x!tpu.dma_semaphore, #tpu.memory_space<semaphore_mem>> -> memref<1x!tpu.dma_semaphore, #tpu.memory_space<semaphore_mem>>
    %3 = tpu.memref_squeeze %2 : memref<1x!tpu.dma_semaphore, #tpu.memory_space<semaphore_mem>> -> memref<!tpu.dma_semaphore, #tpu.memory_space<semaphore_mem>>
    tpu.enqueue_dma source(%0 : memref<128x16xf32, #tpu.memory_space<any>>) target(%1 : memref<128x16xf32, #tpu.memory_space<any>>) target_semaphore(%3 : memref<!tpu.dma_semaphore, #tpu.memory_space<semaphore_mem>>)
    %c0_i32_4 = arith.constant 0 : i32
    %c0_i32_5 = arith.constant 0 : i32
    %c0_i32_6 = arith.constant 0 : i32
    %4 = tpu.memref_slice %arg0[%c0_i32_5, %c0_i32_6] : memref<128x16xf32, #tpu.memory_space<any>> -> memref<128x16xf32, #tpu.memory_space<any>>
    %c0_i32_7 = arith.constant 0 : i32
    %c0_i32_8 = arith.constant 0 : i32
    %5 = tpu.memref_slice %arg1[%c0_i32_7, %c0_i32_8] : memref<128x16xf32, #tpu.memory_space<any>> -> memref<128x16xf32, #tpu.memory_space<any>>
    %6 = tpu.memref_slice %arg2[%c0_i32_4] : memref<1x!tpu.dma_semaphore, #tpu.memory_space<semaphore_mem>> -> memref<1x!tpu.dma_semaphore, #tpu.memory_space<semaphore_mem>>
    %7 = tpu.memref_squeeze %6 : memref<1x!tpu.dma_semaphore, #tpu.memory_space<semaphore_mem>> -> memref<!tpu.dma_semaphore, #tpu.memory_space<semaphore_mem>>
    tpu.wait_dma2 semaphore(%7 : memref<!tpu.dma_semaphore, #tpu.memory_space<semaphore_mem>>) src(%4 : memref<128x16xf32, #tpu.memory_space<any>>) dst(%5 : memref<128x16xf32, #tpu.memory_space<any>>)
    return
  }
}

</mosaic_0001>

<bundles_post_ra>
// kernel: tpu_custom_call.1
= control target key start
LH: loop header
LB: loop body
LE: loop exit
PB: predicated region body
PF: predicated region fallthrough
CT: control target
= control target key end

     0   :  { %s205_s0 = inlined_call_operand.vmem [shape: f32[128,16], index: 0, kind: input, shape index: {}]   ;;  %s206_s1 = inlined_call_operand.vmem [shape: f32[128,16], index: 1, kind: output, shape index: {}]  }
   0x1   :  { %v39_v0 = vld [vmem:[%s205_s0] sm:$0xff]  ;;  %v41_v1 = vld [vmem:[%s205_s0 + $0x8] sm:$0xff]  ;;  %v43_v2 = vld [vmem:[%s205_s0 + $0x10] sm:$0xff] }
   0x2   :  { %40 = vst [vmem:[%s206_s1] sm:$0xff] %v39_v0  ;;  %42 = vst [vmem:[%s206_s1 + $0x8] sm:$0xff] %v41_v1  ;;  %v45_v3 = vld [vmem:[%s205_s0 + $0x18] sm:$0xff]  ;;  %v47_v4 = vld [vmem:[%s205_s0 + $0x20] sm:$0xff] }
   0x3   :  { %44 = vst [vmem:[%s206_s1 + $0x10] sm:$0xff] %v43_v2  ;;  %v49_v5 = vld [vmem:[%s205_s0 + $0x28] sm:$0xff]  ;;  %46 = vst [vmem:[%s206_s1 + $0x18] sm:$0xff] %v45_v3  ;;  %v51_v6 = vld [vmem:[%s205_s0 + $0x30] sm:$0xff] }
   0x4   :  { %48 = vst [vmem:[%s206_s1 + $0x20] sm:$0xff] %v47_v4  ;;  %50 = vst [vmem:[%s206_s1 + $0x28] sm:$0xff] %v49_v5  ;;  %v53_v7 = vld [vmem:[%s205_s0 + $0x38] sm:$0xff]  ;;  %v55_v8 = vld [vmem:[%s205_s0 + $0x40] sm:$0xff] }
   0x5   :  { %52 = vst [vmem:[%s206_s1 + $0x30] sm:$0xff] %v51_v6  ;;  %54 = vst [vmem:[%s206_s1 + $0x38] sm:$0xff] %v53_v7  ;;  %v57_v9 = vld [vmem:[%s205_s0 + $0x48] sm:$0xff]  ;;  %v59_v10 = vld [vmem:[%s205_s0 + $0x50] sm:$0xff] }
   0x6   :  { %56 = vst [vmem:[%s206_s1 + $0x40] sm:$0xff] %v55_v8  ;;  %v61_v11 = vld [vmem:[%s205_s0 + $0x58] sm:$0xff]  ;;  %58 = vst [vmem:[%s206_s1 + $0x48] sm:$0xff] %v57_v9  ;;  %v63_v12 = vld [vmem:[%s205_s0 + $0x60] sm:$0xff] }
   0x7   :  { %60 = vst [vmem:[%s206_s1 + $0x50] sm:$0xff] %v59_v10  ;;  %62 = vst [vmem:[%s206_s1 + $0x58] sm:$0xff] %v61_v11  ;;  %v65_v13 = vld [vmem:[%s205_s0 + $0x68] sm:$0xff]  ;;  %v67_v14 = vld [vmem:[%s205_s0 + $0x70] sm:$0xff] }
   0x8   :  { %64 = vst [vmem:[%s206_s1 + $0x60] sm:$0xff] %v63_v12  ;;  %66 = vst [vmem:[%s206_s1 + $0x68] sm:$0xff] %v65_v13  ;;  %v69_v15 = vld [vmem:[%s205_s0 + $0x78] sm:$0xff] }
   0x9   :  { %68 = vst [vmem:[%s206_s1 + $0x70] sm:$0xff] %v67_v14  ;;  %70 = vst [vmem:[%s206_s1 + $0x78] sm:$0xff] %v69_v15 }
   0xa   :  { %78 = vsyncadd [#allocation2], 2048 }
   0xb   :  { %97 = dma.done.wait [#allocation2], 2048 }
   0xc   :  { %98 = vsyncadd [#allocation2], 4294965248 }
   0xd   :  { %82 = vsyncmov [#allocation2] }
  0x10   :  { %s83_s12 = vpop.sfrf %82 }
  0x11   :  { %p96_p0 = scmp.ne.s32.totalorder %s83_s12, 0 }
  0x13   :  { %87 = shalt.err (%p96_p0)  }

</bundles_post_ra>
